<compile_context>
chip_gen: v5e
topology: v5e:2x2
jax: 0.10.0
libtpu: 0.0.40
codegen_flags: <defaults>
</compile_context>

<pallas_src>
import functools

import jax
import jax.numpy as jnp
from jax.experimental import pallas as pl
from jax.experimental.pallas import tpu as pltpu

_EPS = 1e-5


def _resblock_kernel(a_ref, b_ref,
                     g1_ref, be1_ref, w1_ref, bb1_ref,
                     g2_ref, be2_ref, w2_ref, bb2_ref,
                     out_ref, *, lout, n_valid):
    Cp, NLp = out_ref.shape
    a = a_ref[...]            # maxpool tap 0 (even positions), (Cp, NLp) f32
    b = b_ref[...]            # maxpool tap 1 (odd positions)

    # ---- masks / index helpers: computed once, reused by both convs ----
    lane = jax.lax.broadcasted_iota(jnp.int32, (Cp, NLp), 1)
    pos = lane % lout                      # position within a sample
    first_mask = pos == 0
    last_mask = pos == (lout - 1)
    valid = lane < n_valid                 # lane padding beyond N*Lout
    inv_n = 1.0 / float(n_valid)

    def shift_left(h):       # value at l+1, zero at per-sample end
        return jnp.where(last_mask, 0.0, pltpu.roll(h, shift=NLp - 1, axis=1))

    def shift_right(h):      # value at l-1, zero at per-sample start
        return jnp.where(first_mask, 0.0, pltpu.roll(h, shift=1, axis=1))

    # ---- MaxPool1d(k=3, s=2) over ConstantPad1d((0,1)): tap2 == shift_left(tap0)
    shortcut = jnp.maximum(jnp.maximum(a, b), shift_left(a))
    shortcut = jnp.where(valid, shortcut, 0.0)     # keep lane padding exactly zero

    def bn_relu(h, g_ref, be_ref):
        # training-mode BatchNorm1d: per-channel batch stats over the lane axis,
        # single sweep via sum / sum-of-squares (h is zero on padded lanes).
        s1 = jnp.sum(h, axis=1, keepdims=True)
        s2 = jnp.sum(h * h, axis=1, keepdims=True)
        mean = s1 * inv_n
        var = jnp.maximum(s2 * inv_n - mean * mean, 0.0)
        y = (h - mean) * jax.lax.rsqrt(var + _EPS) * g_ref[...] + be_ref[...]
        return jnp.maximum(y, 0.0)

    def conv3(h, w_ref, bias_ref):
        # Conv1d(C, C, k=3, padding=1) as ONE fused MXU matmul:
        # stack [h_prev; h; h_next] on the sublane axis -> (3*Cp, NLp) bf16,
        # weight (Cp, 3*Cp) bf16, f32 accumulation.
        stacked = jnp.concatenate([shift_right(h), h, shift_left(h)], axis=0)
        y = jnp.dot(w_ref[...], stacked.astype(jnp.bfloat16),
                    preferred_element_type=jnp.float32)
        return y + bias_ref[...]

    h = conv3(bn_relu(shortcut, g1_ref, be1_ref), w1_ref, bb1_ref)
    h = jnp.where(valid, h, 0.0)           # zero lane padding before BN2 batch stats
    h = conv3(bn_relu(h, g2_ref, be2_ref), w2_ref, bb2_ref)

    out_ref[...] = (h + shortcut).astype(out_ref.dtype)


def resnet_block_forward(x, params):
    """x: (N, C, L) float32, NCL like PyTorch. Returns (N, C, Lout)."""
    N, C, L = x.shape
    # TODO(synk): odd L needs one extra per-sample tail tap; even L covers the module's use.
    assert L % 2 == 0, "this kernel assumes an even input length"
    Lout = (L + 1 - 3) // 2 + 1            # ConstantPad1d((0,1)) then MaxPool1d(k=3, s=2)
    NL = N * Lout
    Cp = max(8, ((C + 7) // 8) * 8)        # sublane-aligned channels
    NLp = max(128, ((NL + 127) // 128) * 128)  # lane-dense flattened batch*length

    # ---- glue: one transpose, channel pad, even/odd tap split, lane pad ----
    xt = jnp.transpose(x, (1, 0, 2)).astype(jnp.float32)          # (C, N, L)
    xt = jnp.pad(xt, ((0, Cp - C), (0, 0), (0, 0)))               # (Cp, N, L)
    a = xt[:, :, 0::2].reshape(Cp, NL)                            # window tap 0
    b = xt[:, :, 1::2].reshape(Cp, NL)                            # window tap 1
    lane_pad = ((0, 0), (0, NLp - NL))
    a = jnp.pad(a, lane_pad)
    b = jnp.pad(b, lane_pad)

    def col(v):
        return jnp.pad(v.astype(jnp.float32), (0, Cp - C)).reshape(Cp, 1)

    def prep_w(W):
        # (Cout, Cin, k) -> padded -> (Cout, k, Cin) -> (Cp, 3*Cp) bf16,
        # matching the [h_prev; h; h_next] sublane stacking of the matmul operand.
        Wp = jnp.zeros((Cp, Cp, 3), jnp.float32).at[:C, :C, :].set(
            W.astype(jnp.float32))
        return jnp.transpose(Wp, (0, 2, 1)).reshape(Cp, 3 * Cp).astype(jnp.bfloat16)

    ins = [
        a, b,
        col(params['g1']), col(params['be1']), prep_w(params['W1']), col(params['b1']),
        col(params['g2']), col(params['be2']), prep_w(params['W2']), col(params['b2']),
    ]

    slab_bytes = Cp * NLp * 4
    vmem_limit = int(min(64 * 2**20, max(32 * 2**20, 24 * slab_bytes)))

    in_specs = [
        pl.BlockSpec((Cp, NLp), lambda i: (0, 0)),        # a
        pl.BlockSpec((Cp, NLp), lambda i: (0, 0)),        # b
        pl.BlockSpec((Cp, 1), lambda i: (0, 0)),          # g1
        pl.BlockSpec((Cp, 1), lambda i: (0, 0)),          # be1
        pl.BlockSpec((Cp, 3 * Cp), lambda i: (0, 0)),     # W1
        pl.BlockSpec((Cp, 1), lambda i: (0, 0)),          # b1
        pl.BlockSpec((Cp, 1), lambda i: (0, 0)),          # g2
        pl.BlockSpec((Cp, 1), lambda i: (0, 0)),          # be2
        pl.BlockSpec((Cp, 3 * Cp), lambda i: (0, 0)),     # W2
        pl.BlockSpec((Cp, 1), lambda i: (0, 0)),          # b2
    ]

    out2d = pl.pallas_call(
        functools.partial(_resblock_kernel, lout=Lout, n_valid=NL),
        out_shape=jax.ShapeDtypeStruct((Cp, NLp), jnp.float32),
        grid=(1,),
        in_specs=in_specs,
        out_specs=pl.BlockSpec((Cp, NLp), lambda i: (0, 0)),
        compiler_params=pltpu.CompilerParams(
            dimension_semantics=("arbitrary",),
            vmem_limit_bytes=vmem_limit),
    )(*ins)

    out = out2d[:C, :NL].reshape(C, N, Lout)
    return jnp.transpose(out, (1, 0, 2))


def ref_forward(x, p):
    """Pure-JAX reference mirroring the PyTorch module (for verification)."""
    N, C, L = x.shape
    xp = jnp.pad(x, ((0, 0), (0, 0), (0, 1)))
    Lout = (L + 1 - 3) // 2 + 1
    shortcut = jnp.stack(
        [jnp.max(xp[:, :, 2 * i:2 * i + 3], axis=-1) for i in range(Lout)], axis=-1)

    def bn(h, g, b):
        mean = jnp.mean(h, axis=(0, 2), keepdims=True)
        var = jnp.mean((h - mean) ** 2, axis=(0, 2), keepdims=True)
        return (h - mean) / jnp.sqrt(var + _EPS) * g.reshape(1, C, 1) + b.reshape(1, C, 1)

    def conv(h, w, b):
        y = jax.lax.conv_general_dilated(
            h, w, window_strides=(1,), padding=((1, 1),),
            dimension_numbers=('NCH', 'OIH', 'NCH'),
            precision=jax.lax.Precision.HIGHEST)
        return y + b.reshape(1, C, 1)

    h = jax.nn.relu(bn(shortcut, p['g1'], p['be1']))
    h = conv(h, p['W1'], p['b1'])
    h = jax.nn.relu(bn(h, p['g2'], p['be2']))
    h = conv(h, p['W2'], p['b2'])
    return h + shortcut


if __name__ == "__main__":
    N, C, L = 2, 4, 16
    key = jax.random.PRNGKey(0)
    ks = jax.random.split(key, 9)
    x = jax.random.normal(ks[0], (N, C, L), jnp.float32)
    params = dict(
        g1=1.0 + 0.1 * jax.random.normal(ks[1], (C,), jnp.float32),
        be1=0.1 * jax.random.normal(ks[2], (C,), jnp.float32),
        W1=0.1 * jax.random.normal(ks[3], (C, C, 3), jnp.float32),
        b1=0.1 * jax.random.normal(ks[4], (C,), jnp.float32),
        g2=1.0 + 0.1 * jax.random.normal(ks[5], (C,), jnp.float32),
        be2=0.1 * jax.random.normal(ks[6], (C,), jnp.float32),
        W2=0.1 * jax.random.normal(ks[7], (C, C, 3), jnp.float32),
        b2=0.1 * jax.random.normal(ks[8], (C,), jnp.float32),
    )

    out = resnet_block_forward(x, params)
    jax.block_until_ready(out)

    ref = ref_forward(x, params)
    assert out.shape == (N, C, (L + 1 - 3) // 2 + 1), out.shape
    max_err = float(jnp.max(jnp.abs(out - ref)))
    # tolerance absorbs bf16 MXU operands and the E[x^2]-mean^2 BN formulation
    # vs. the f32 HIGHEST-precision XLA reference
    assert max_err < 5e-2, f"max abs error too large: {max_err}"

    print("KERNEL_OK")
</pallas_src>

<mosaic_0001>
module attributes {stable_mosaic.version = 11 : i64} {
  func.func @_resblock_kernel(%arg0: i32, %arg1: memref<8x128xf32, #tpu.memory_space<vmem>>, %arg2: memref<8x128xf32, #tpu.memory_space<vmem>>, %arg3: memref<8x1xf32, #tpu.memory_space<vmem>>, %arg4: memref<8x1xf32, #tpu.memory_space<vmem>>, %arg5: memref<8x24xbf16, #tpu.memory_space<vmem>>, %arg6: memref<8x1xf32, #tpu.memory_space<vmem>>, %arg7: memref<8x1xf32, #tpu.memory_space<vmem>>, %arg8: memref<8x1xf32, #tpu.memory_space<vmem>>, %arg9: memref<8x24xbf16, #tpu.memory_space<vmem>>, %arg10: memref<8x1xf32, #tpu.memory_space<vmem>>, %arg11: memref<8x128xf32, #tpu.memory_space<vmem>>) attributes {dimension_semantics = [#tpu.dimension_semantics<arbitrary>], iteration_bounds = array<i64: 1>, scalar_prefetch = 0 : i64, scratch_operands = 0 : i64, tpu.core_type = #tpu.core_type<tc>, window_params = [{pipeline_mode = #tpu.pipeline_mode<synchronous>, transform_indices = @transform_0, window_bounds = array<i64: 8, 128>}, {pipeline_mode = #tpu.pipeline_mode<synchronous>, transform_indices = @transform_1, window_bounds = array<i64: 8, 128>}, {pipeline_mode = #tpu.pipeline_mode<synchronous>, transform_indices = @transform_2, window_bounds = array<i64: 8, 1>}, {pipeline_mode = #tpu.pipeline_mode<synchronous>, transform_indices = @transform_3, window_bounds = array<i64: 8, 1>}, {pipeline_mode = #tpu.pipeline_mode<synchronous>, transform_indices = @transform_4, window_bounds = array<i64: 8, 24>}, {pipeline_mode = #tpu.pipeline_mode<synchronous>, transform_indices = @transform_5, window_bounds = array<i64: 8, 1>}, {pipeline_mode = #tpu.pipeline_mode<synchronous>, transform_indices = @transform_6, window_bounds = array<i64: 8, 1>}, {pipeline_mode = #tpu.pipeline_mode<synchronous>, transform_indices = @transform_7, window_bounds = array<i64: 8, 1>}, {pipeline_mode = #tpu.pipeline_mode<synchronous>, transform_indices = @transform_8, window_bounds = array<i64: 8, 24>}, {pipeline_mode = #tpu.pipeline_mode<synchronous>, transform_indices = @transform_9, window_bounds = array<i64: 8, 1>}, {pipeline_mode = #tpu.pipeline_mode<synchronous>, transform_indices = @transform_10, window_bounds = array<i64: 8, 128>}]} {
    %c0 = arith.constant 0 : index
    %c0_0 = arith.constant 0 : index
    %0 = vector.load %arg1[%c0, %c0_0] : memref<8x128xf32, #tpu.memory_space<vmem>>, vector<8x128xf32>
    %c0_1 = arith.constant 0 : index
    %c0_2 = arith.constant 0 : index
    %1 = vector.load %arg2[%c0_1, %c0_2] : memref<8x128xf32, #tpu.memory_space<vmem>>, vector<8x128xf32>
    %2 = tpu.iota {dimensions = array<i32: 1>} : vector<8x128xi32>
    %c8_i32 = arith.constant 8 : i32
    %c0_i32 = arith.constant 0 : i32
    %3 = arith.cmpi eq, %c8_i32, %c0_i32 : i32
    %c1_i32 = arith.constant 1 : i32
    %4 = arith.select %3, %c1_i32, %c8_i32 : i32
    %5 = vector.broadcast %4 : i32 to vector<8x128xi32>
    %6 = arith.remsi %2, %5 : vector<8x128xi32>
    %c0_i32_3 = arith.constant 0 : i32
    %7 = vector.broadcast %c0_i32_3 : i32 to vector<8x128xi32>
    %8 = arith.cmpi ne, %6, %7 : vector<8x128xi32>
    %c0_i32_4 = arith.constant 0 : i32
    %9 = vector.broadcast %c0_i32_4 : i32 to vector<8x128xi32>
    %10 = arith.cmpi slt, %6, %9 : vector<8x128xi32>
    %c0_i32_5 = arith.constant 0 : i32
    %11 = arith.cmpi slt, %4, %c0_i32_5 : i32
    %12 = vector.broadcast %11 : i1 to vector<8x128xi1>
    %13 = vector.broadcast %12 : vector<8x128xi1> to vector<8x128xi1>
    %14 = arith.xori %10, %13 : vector<8x128xi1>
    %15 = arith.andi %14, %8 : vector<8x128xi1>
    %16 = vector.broadcast %4 : i32 to vector<8x128xi32>
    %17 = arith.addi %6, %16 : vector<8x128xi32>
    %18 = arith.select %15, %17, %6 : vector<8x128xi1>, vector<8x128xi32>
    %c0_i32_6 = arith.constant 0 : i32
    %19 = vector.broadcast %c0_i32_6 : i32 to vector<8x128xi32>
    %20 = arith.cmpi eq, %18, %19 : vector<8x128xi32>
    %c7_i32 = arith.constant 7 : i32
    %21 = vector.broadcast %c7_i32 : i32 to vector<8x128xi32>
    %22 = arith.cmpi eq, %18, %21 : vector<8x128xi32>
    %c16_i32 = arith.constant 16 : i32
    %23 = vector.broadcast %c16_i32 : i32 to vector<8x128xi32>
    %24 = arith.cmpi slt, %2, %23 : vector<8x128xi32>
    %25 = arith.maximumf %0, %1 : vector<8x128xf32>
    %c127_i32 = arith.constant 127 : i32
    %26 = tpu.dynamic_rotate %0 by %c127_i32 dim 1 : vector<8x128xf32>, i32 -> vector<8x128xf32>
    %cst = arith.constant 0.000000e+00 : f32
    %27 = vector.broadcast %cst : f32 to vector<8x128xf32>
    %28 = arith.select %22, %27, %26 : vector<8x128xi1>, vector<8x128xf32>
    %29 = arith.maximumf %25, %28 : vector<8x128xf32>
    %cst_7 = arith.constant 0.000000e+00 : f32
    %30 = vector.broadcast %cst_7 : f32 to vector<8x128xf32>
    %31 = arith.select %24, %29, %30 : vector<8x128xi1>, vector<8x128xf32>
    %cst_8 = arith.constant dense<0.000000e+00> : vector<8xf32>
    %32 = vector.multi_reduction <add>, %31, %cst_8 [1] : vector<8x128xf32> to vector<8xf32>
    %33 = vector.shape_cast %32 : vector<8xf32> to vector<8x1xf32>
    %34 = arith.mulf %31, %31 : vector<8x128xf32>
    %cst_9 = arith.constant dense<0.000000e+00> : vector<8xf32>
    %35 = vector.multi_reduction <add>, %34, %cst_9 [1] : vector<8x128xf32> to vector<8xf32>
    %36 = vector.shape_cast %35 : vector<8xf32> to vector<8x1xf32>
    %cst_10 = arith.constant 6.250000e-02 : f32
    %37 = vector.broadcast %cst_10 : f32 to vector<8x1xf32>
    %38 = arith.mulf %33, %37 : vector<8x1xf32>
    %cst_11 = arith.constant 6.250000e-02 : f32
    %39 = vector.broadcast %cst_11 : f32 to vector<8x1xf32>
    %40 = arith.mulf %36, %39 : vector<8x1xf32>
    %41 = arith.mulf %38, %38 : vector<8x1xf32>
    %42 = arith.subf %40, %41 : vector<8x1xf32>
    %cst_12 = arith.constant 0.000000e+00 : f32
    %43 = vector.broadcast %cst_12 : f32 to vector<8x1xf32>
    %44 = arith.maximumf %42, %43 : vector<8x1xf32>
    %45 = vector.broadcast %38 : vector<8x1xf32> to vector<8x128xf32>
    %46 = arith.subf %31, %45 : vector<8x128xf32>
    %cst_13 = arith.constant 9.99999974E-6 : f32
    %47 = vector.broadcast %cst_13 : f32 to vector<8x1xf32>
    %48 = arith.addf %44, %47 : vector<8x1xf32>
    %49 = math.rsqrt %48 : vector<8x1xf32>
    %50 = vector.broadcast %49 : vector<8x1xf32> to vector<8x128xf32>
    %51 = arith.mulf %46, %50 : vector<8x128xf32>
    %c0_14 = arith.constant 0 : index
    %c0_15 = arith.constant 0 : index
    %52 = vector.load %arg3[%c0_14, %c0_15] : memref<8x1xf32, #tpu.memory_space<vmem>>, vector<8x1xf32>
    %53 = vector.broadcast %52 : vector<8x1xf32> to vector<8x128xf32>
    %54 = arith.mulf %51, %53 : vector<8x128xf32>
    %c0_16 = arith.constant 0 : index
    %c0_17 = arith.constant 0 : index
    %55 = vector.load %arg4[%c0_16, %c0_17] : memref<8x1xf32, #tpu.memory_space<vmem>>, vector<8x1xf32>
    %56 = vector.broadcast %55 : vector<8x1xf32> to vector<8x128xf32>
    %57 = arith.addf %54, %56 : vector<8x128xf32>
    %cst_18 = arith.constant 0.000000e+00 : f32
    %58 = vector.broadcast %cst_18 : f32 to vector<8x128xf32>
    %59 = arith.maximumf %57, %58 : vector<8x128xf32>
    %c1_i32_19 = arith.constant 1 : i32
    %60 = tpu.dynamic_rotate %59 by %c1_i32_19 dim 1 : vector<8x128xf32>, i32 -> vector<8x128xf32>
    %cst_20 = arith.constant 0.000000e+00 : f32
    %61 = vector.broadcast %cst_20 : f32 to vector<8x128xf32>
    %62 = arith.select %20, %61, %60 : vector<8x128xi1>, vector<8x128xf32>
    %c127_i32_21 = arith.constant 127 : i32
    %63 = tpu.dynamic_rotate %59 by %c127_i32_21 dim 1 : vector<8x128xf32>, i32 -> vector<8x128xf32>
    %cst_22 = arith.constant 0.000000e+00 : f32
    %64 = vector.broadcast %cst_22 : f32 to vector<8x128xf32>
    %65 = arith.select %22, %64, %63 : vector<8x128xi1>, vector<8x128xf32>
    %66 = tpu.concatenate %62, %59, %65 in 0 : vector<8x128xf32>, vector<8x128xf32>, vector<8x128xf32> -> vector<24x128xf32>
    %c0_23 = arith.constant 0 : index
    %c0_24 = arith.constant 0 : index
    %67 = vector.load %arg5[%c0_23, %c0_24] : memref<8x24xbf16, #tpu.memory_space<vmem>>, vector<8x24xbf16>
    %68 = arith.truncf %66 : vector<24x128xf32> to vector<24x128xbf16>
    %cst_25 = arith.constant dense<0.000000e+00> : vector<8x128xf32>
    %69 = tpu.matmul %67, %68, %cst_25 {dimension_numbers = #tpu.dot_dimension_numbers<[1], [0], [0], [1], [0, 0, 1, 1], [], []>} : vector<8x24xbf16>, vector<24x128xbf16>, vector<8x128xf32> -> vector<8x128xf32>
    %c0_26 = arith.constant 0 : index
    %c0_27 = arith.constant 0 : index
    %70 = vector.load %arg6[%c0_26, %c0_27] : memref<8x1xf32, #tpu.memory_space<vmem>>, vector<8x1xf32>
    %71 = vector.broadcast %70 : vector<8x1xf32> to vector<8x128xf32>
    %72 = arith.addf %69, %71 : vector<8x128xf32>
    %cst_28 = arith.constant 0.000000e+00 : f32
    %73 = vector.broadcast %cst_28 : f32 to vector<8x128xf32>
    %74 = arith.select %24, %72, %73 : vector<8x128xi1>, vector<8x128xf32>
    %cst_29 = arith.constant dense<0.000000e+00> : vector<8xf32>
    %75 = vector.multi_reduction <add>, %74, %cst_29 [1] : vector<8x128xf32> to vector<8xf32>
    %76 = vector.shape_cast %75 : vector<8xf32> to vector<8x1xf32>
    %77 = arith.mulf %74, %74 : vector<8x128xf32>
    %cst_30 = arith.constant dense<0.000000e+00> : vector<8xf32>
    %78 = vector.multi_reduction <add>, %77, %cst_30 [1] : vector<8x128xf32> to vector<8xf32>
    %79 = vector.shape_cast %78 : vector<8xf32> to vector<8x1xf32>
    %cst_31 = arith.constant 6.250000e-02 : f32
    %80 = vector.broadcast %cst_31 : f32 to vector<8x1xf32>
    %81 = arith.mulf %76, %80 : vector<8x1xf32>
    %cst_32 = arith.constant 6.250000e-02 : f32
    %82 = vector.broadcast %cst_32 : f32 to vector<8x1xf32>
    %83 = arith.mulf %79, %82 : vector<8x1xf32>
    %84 = arith.mulf %81, %81 : vector<8x1xf32>
    %85 = arith.subf %83, %84 : vector<8x1xf32>
    %cst_33 = arith.constant 0.000000e+00 : f32
    %86 = vector.broadcast %cst_33 : f32 to vector<8x1xf32>
    %87 = arith.maximumf %85, %86 : vector<8x1xf32>
    %88 = vector.broadcast %81 : vector<8x1xf32> to vector<8x128xf32>
    %89 = arith.subf %74, %88 : vector<8x128xf32>
    %cst_34 = arith.constant 9.99999974E-6 : f32
    %90 = vector.broadcast %cst_34 : f32 to vector<8x1xf32>
    %91 = arith.addf %87, %90 : vector<8x1xf32>
    %92 = math.rsqrt %91 : vector<8x1xf32>
    %93 = vector.broadcast %92 : vector<8x1xf32> to vector<8x128xf32>
    %94 = arith.mulf %89, %93 : vector<8x128xf32>
    %c0_35 = arith.constant 0 : index
    %c0_36 = arith.constant 0 : index
    %95 = vector.load %arg7[%c0_35, %c0_36] : memref<8x1xf32, #tpu.memory_space<vmem>>, vector<8x1xf32>
    %96 = vector.broadcast %95 : vector<8x1xf32> to vector<8x128xf32>
    %97 = arith.mulf %94, %96 : vector<8x128xf32>
    %c0_37 = arith.constant 0 : index
    %c0_38 = arith.constant 0 : index
    %98 = vector.load %arg8[%c0_37, %c0_38] : memref<8x1xf32, #tpu.memory_space<vmem>>, vector<8x1xf32>
    %99 = vector.broadcast %98 : vector<8x1xf32> to vector<8x128xf32>
    %100 = arith.addf %97, %99 : vector<8x128xf32>
    %cst_39 = arith.constant 0.000000e+00 : f32
    %101 = vector.broadcast %cst_39 : f32 to vector<8x128xf32>
    %102 = arith.maximumf %100, %101 : vector<8x128xf32>
    %c1_i32_40 = arith.constant 1 : i32
    %103 = tpu.dynamic_rotate %102 by %c1_i32_40 dim 1 : vector<8x128xf32>, i32 -> vector<8x128xf32>
    %cst_41 = arith.constant 0.000000e+00 : f32
    %104 = vector.broadcast %cst_41 : f32 to vector<8x128xf32>
    %105 = arith.select %20, %104, %103 : vector<8x128xi1>, vector<8x128xf32>
    %c127_i32_42 = arith.constant 127 : i32
    %106 = tpu.dynamic_rotate %102 by %c127_i32_42 dim 1 : vector<8x128xf32>, i32 -> vector<8x128xf32>
    %cst_43 = arith.constant 0.000000e+00 : f32
    %107 = vector.broadcast %cst_43 : f32 to vector<8x128xf32>
    %108 = arith.select %22, %107, %106 : vector<8x128xi1>, vector<8x128xf32>
    %109 = tpu.concatenate %105, %102, %108 in 0 : vector<8x128xf32>, vector<8x128xf32>, vector<8x128xf32> -> vector<24x128xf32>
    %c0_44 = arith.constant 0 : index
    %c0_45 = arith.constant 0 : index
    %110 = vector.load %arg9[%c0_44, %c0_45] : memref<8x24xbf16, #tpu.memory_space<vmem>>, vector<8x24xbf16>
    %111 = arith.truncf %109 : vector<24x128xf32> to vector<24x128xbf16>
    %cst_46 = arith.constant dense<0.000000e+00> : vector<8x128xf32>
    %112 = tpu.matmul %110, %111, %cst_46 {dimension_numbers = #tpu.dot_dimension_numbers<[1], [0], [0], [1], [0, 0, 1, 1], [], []>} : vector<8x24xbf16>, vector<24x128xbf16>, vector<8x128xf32> -> vector<8x128xf32>
    %c0_47 = arith.constant 0 : index
    %c0_48 = arith.constant 0 : index
    %113 = vector.load %arg10[%c0_47, %c0_48] : memref<8x1xf32, #tpu.memory_space<vmem>>, vector<8x1xf32>
    %114 = vector.broadcast %113 : vector<8x1xf32> to vector<8x128xf32>
    %115 = arith.addf %112, %114 : vector<8x128xf32>
    %116 = arith.addf %115, %31 : vector<8x128xf32>
    %c0_49 = arith.constant 0 : index
    %c0_50 = arith.constant 0 : index
    %117 = vector.load %arg11[%c0_49, %c0_50] : memref<8x128xf32, #tpu.memory_space<vmem>>, vector<8x128xf32>
    tpu.vector_store %arg11[%c0_49, %c0_50], %116 {strides = array<i32>} : memref<8x128xf32, #tpu.memory_space<vmem>>, vector<8x128xf32>,
    return
  }
  func.func @transform_0(%arg0: i32) -> (i32, i32) {
    %c0_i32 = arith.constant 0 : i32
    %c0_i32_0 = arith.constant 0 : i32
    %c0_i32_1 = arith.constant 0 : i32
    return %c0_i32, %c0_i32_0 : i32, i32
  }
  func.func @transform_1(%arg0: i32) -> (i32, i32) {
    %c0_i32 = arith.constant 0 : i32
    %c0_i32_0 = arith.constant 0 : i32
    %c0_i32_1 = arith.constant 0 : i32
    return %c0_i32, %c0_i32_0 : i32, i32
  }
  func.func @transform_2(%arg0: i32) -> (i32, i32) {
    %c0_i32 = arith.constant 0 : i32
    %c0_i32_0 = arith.constant 0 : i32
    %c0_i32_1 = arith.constant 0 : i32
    return %c0_i32, %c0_i32_0 : i32, i32
  }
  func.func @transform_3(%arg0: i32) -> (i32, i32) {
    %c0_i32 = arith.constant 0 : i32
    %c0_i32_0 = arith.constant 0 : i32
    %c0_i32_1 = arith.constant 0 : i32
    return %c0_i32, %c0_i32_0 : i32, i32
  }
  func.func @transform_4(%arg0: i32) -> (i32, i32) {
    %c0_i32 = arith.constant 0 : i32
    %c0_i32_0 = arith.constant 0 : i32
    %c0_i32_1 = arith.constant 0 : i32
    return %c0_i32, %c0_i32_0 : i32, i32
  }
  func.func @transform_5(%arg0: i32) -> (i32, i32) {
    %c0_i32 = arith.constant 0 : i32
    %c0_i32_0 = arith.constant 0 : i32
    %c0_i32_1 = arith.constant 0 : i32
    return %c0_i32, %c0_i32_0 : i32, i32
  }
  func.func @transform_6(%arg0: i32) -> (i32, i32) {
    %c0_i32 = arith.constant 0 : i32
    %c0_i32_0 = arith.constant 0 : i32
    %c0_i32_1 = arith.constant 0 : i32
    return %c0_i32, %c0_i32_0 : i32, i32
  }
  func.func @transform_7(%arg0: i32) -> (i32, i32) {
    %c0_i32 = arith.constant 0 : i32
    %c0_i32_0 = arith.constant 0 : i32
    %c0_i32_1 = arith.constant 0 : i32
    return %c0_i32, %c0_i32_0 : i32, i32
  }
  func.func @transform_8(%arg0: i32) -> (i32, i32) {
    %c0_i32 = arith.constant 0 : i32
    %c0_i32_0 = arith.constant 0 : i32
    %c0_i32_1 = arith.constant 0 : i32
    return %c0_i32, %c0_i32_0 : i32, i32
  }
  func.func @transform_9(%arg0: i32) -> (i32, i32) {
    %c0_i32 = arith.constant 0 : i32
    %c0_i32_0 = arith.constant 0 : i32
    %c0_i32_1 = arith.constant 0 : i32
    return %c0_i32, %c0_i32_0 : i32, i32
  }
  func.func @transform_10(%arg0: i32) -> (i32, i32) {
    %c0_i32 = arith.constant 0 : i32
    %c0_i32_0 = arith.constant 0 : i32
    %c0_i32_1 = arith.constant 0 : i32
    return %c0_i32, %c0_i32_0 : i32, i32
  }
}

</mosaic_0001>

<bundles_post_ra>
// kernel: tpu_custom_call.1
= control target key start
LH: loop header
LB: loop body
LE: loop exit
PB: predicated region body
PF: predicated region fallthrough
CT: control target
= control target key end

     0   :  { %s411_s0 = inlined_call_operand.vmem [shape: f32[8,128], index: 0, kind: input, shape index: {}]   ;;  %s412_s1 = inlined_call_operand.vmem [shape: f32[8,128], index: 1, kind: input, shape index: {}]   ;;  %s413_s2 = inlined_call_operand.vmem [shape: f32[8,1], index: 2, kind: input, shape index: {}]   ;;  %s414_s3 = inlined_call_operand.vmem [shape: f32[8,1], index: 3, kind: input, shape index: {}]   ;;  %s415_s4 = inlined_call_operand.vmem [shape: bf16[8,24], index: 4, kind: input, shape index: {}]   ;;  %s416_s5 = inlined_call_operand.vmem [shape: f32[8,1], index: 5, kind: input, shape index: {}]   ;;  %s417_s6 = inlined_call_operand.vmem [shape: f32[8,1], index: 6, kind: input, shape index: {}]   ;;  %s418_s7 = inlined_call_operand.vmem [shape: f32[8,1], index: 7, kind: input, shape index: {}]   ;;  %s419_s8 = inlined_call_operand.vmem [shape: bf16[8,24], index: 8, kind: input, shape index: {}]   ;;  %s420_s9 = inlined_call_operand.vmem [shape: f32[8,1], index: 9, kind: input, shape index: {}]   ;;  %s421_s10 = inlined_call_operand.hbm [shape: f32[8,128], index: 10, kind: output, shape index: {}]  }
   0x1   :  { %v37_v0 = vld [vmem:[%s411_s0] sm:$0xff] }
   0x2   :  { %15 = vsyncpa [#allocation3], 0  ;;  %s276_s15 = smov 127   ;;  %v277_v1 = vmov 0   ;;  %v39_v2 = vlaneseq  ;;  %v38_v5 = vld [vmem:[%s412_s1] sm:$0xff]  ;;  %vm119_vm5 = vcmask 1043456  }
   0x3   :  { %57 = vrot.lane.b32.xlu0 %v37_v0, %s276_s15  ;;  %243 = vset.pattern.permute.xlu1 %v277_v1  ;;  %v56_v6 = vmax.f32 %v37_v0, %v38_v5  ;;  %v92_v9 = vld [vmem:[%s414_s3] sm:$0xff]  ;;  %vm279_vm7 = vmmov 1   ;;  %vm115_vm9 = vcmask 195584   ;;  %s218_s30 = sshll.u32 %s421_s10, 4  ;;  %s219_s30 = int_to_ptr.hbm [resolvable:$true] %s218_s30 }
   0x4   :  { %244 = vset.pattern.permute.xlu2 %v277_v1  ;;  %245 = vset.pattern.permute.xlu0 %v277_v1  ;;  %v340_v3 = vand.u32 127, %v39_v2  ;;  %v85_v14 = vld [vmem:[%s413_s2] sm:$0xff]  ;;  %s278_s2 = smov 1  }
   0x5   :  { %95 = vperm.xlu2 %244, %v92_v9   ;;  %v109_v37 = vld [vmem:[%s416_s5] sm:$0xff] }
   0x6   :  { %v45_v4 = vand.u32 7, %v340_v3  ;;  %vm55_vm1 = vcmp.lt.s32.totalorder %v340_v3, 16  ;;  %v106_v45 = vld [vmem:[%s415_s4] sm:$0xf] }
   0x7   :  { %v160_v46 = vld [vmem:[%s417_s6] sm:$0xff] }
   0x8   :  { %vm346_vm0 = vcmp.eq.s32.totalorder %v45_v4, 7  ;;  %vm237_vm6 = vcmp.ne.s32.totalorder %v45_v4, 0  ;;  %v167_v53 = vld [vmem:[%s418_s7] sm:$0xff] }
   0x9   :  { %vm375_vm8 = vmpackc.low %vm279_vm7, %vm237_vm6  ;;  %v184_v54 = vld [vmem:[%s420_s9] sm:$0xff]  ;;  %s280_s9 = smov [#allocation2]  }
   0xa   :  { %s216_s27 = sshll.u32 %s280_s9, 4  ;;  %s217_s27 = int_to_ptr.vmem [resolvable:$true] %s216_s27 }
  0x5f   :  { %v96_v33 = vpop.permute.xlu2 %95 }
  0x75   :  { %v58_v8 = vpop.permute.xlu0 %57 }
  0x76   :  { %v59_v10 = vsel %vm346_vm0, 0.0, %v58_v8 }
  0x77   :  { %v60_v11 = vmax.f32 %v56_v6, %v59_v10 }
  0x79   :  { %v358_v12 = vsel %vm55_vm1, %v60_v11, 0.0 }
  0x7a   :  { %62 = vadd.xlane.f32.xlu0 %v358_v12  ;;  %v64_v13 = vmul.f32 %v358_v12, %v358_v12 }
  0x7c   :  { %65 = vadd.xlane.f32.xlu1 %v64_v13 }
  0x8e   :  { %163 = vperm.xlu0 %245, %v160_v46  }
  0x95   :  { %88 = vperm.xlu1 %243, %v85_v14  }
  0xed   :  { %v63_v15 = vpop.xlane.xlu0 %62 }
  0xee   :  { %v67_v16 = vmul.f32 0.0625, %v63_v15 }
  0xef   :  { %v66_v17 = vpop.xlane.xlu1 %65 }
  0xf0   :  { %v69_v18 = vmul.f32 %v67_v16, %v67_v16  ;;  %v68_v19 = vmul.f32 0.0625, %v66_v17  ;;  %v72_v29 = vsub.f32 %v358_v12, %v67_v16 }
  0xf2   :  { %v70_v20 = vsub.f32 %v68_v19, %v69_v18 }
  0xf4   :  { %v71_v21 = vmax.f32 %v70_v20, 0.0 }
  0xf6   :  { %v73_v22 = vadd.f32 1e-05, %v71_v21  ;;  %v181_v21 = vld [vmem:[%s419_s8] sm:$0xf] }
  0xf8   :  { %246 = vrsqrt.f32 %v73_v22  ;;  %vm80_vm3 = vweird.f32 %v73_v22 }
  0xfe   :  { %v247_v23 = vpop.eup %246 }
  0xff   :  { %v75_v24 = vmul.f32 %v247_v23, %v73_v22  ;;  %vm81_vm2 = vweird.f32 %v247_v23 }
 0x100   :  { %vm82_vm4 = vmor %vm80_vm3, %vm81_vm2  ;;  %v164_v6 = vpop.permute.xlu0 %163 }
 0x101   :  { %v76_v25 = vmul.f32 %v247_v23, %v75_v24 }
 0x103   :  { %v77_v26 = vmul.f32 0.5, %v76_v25 }
 0x105   :  { %v78_v27 = vsub.f32 1.5, %v77_v26 }
 0x107   :  { %v79_v28 = vmul.f32 %v247_v23, %v78_v27  ;;  %v89_v31 = vpop.permute.xlu1 %88 }
 0x109   :  { %v83_v30 = vsel %vm82_vm4, %v247_v23, %v79_v28 }
 0x10a   :  { %v84_v32 = vmul.f32 %v83_v30, %v72_v29 }
 0x10c   :  { %v91_v34 = vmul.f32 %v89_v31, %v84_v32 }
 0x10e   :  { %v98_v35 = vadd.f32 %v96_v33, %v91_v34 }
 0x110   :  { %v99_v36 = vmax.f32 %v98_v35, 0.0 }
 0x112   :  { %103 = vrot.lane.b32.xlu2 %v99_v36, %s276_s15 }
 0x11a   :  { %100 = vrot.lane.b32.xlu2 %v99_v36, %s278_s2 }
 0x122   :  { %112 = vperm.xlu2 %244, %v109_v37  }
 0x16c   :  { %v104_v38 = vpop.permute.xlu2 %103 }
 0x16d   :  { %v105_v39 = vsel %vm346_vm0, 0.0, %v104_v38 }
 0x16e   :  { %v108_v40 = vpack.c.bf16 %v105_v39, %v105_v39 }
 0x170   :  { %v121_v41 = vsel %vm119_vm5, %v108_v40, 0 }
 0x171   :  { %129 = vmatpush.bf16.msra.mxu0 %v121_v41 }
 0x174   :  { %v101_v42 = vpop.permute.xlu2 %100 }
 0x175   :  { %v229_v44 = vpack.c.bf16 %v99_v36, %v101_v42 }
 0x177   :  { %230 = vmatpush.bf16.msk.msra.mxu0 %vm375_vm8, %v229_v44 }
 0x17a   :  { %231 = vmatmul.msk.bf16.vlgmr.msra.gmra.mxu0 %vm115_vm9, %v106_v45 }
 0x17c   :  { %v113_v47 = vpop.permute.xlu2 %112 }
 0x1f7   :  { %v132_v48 = vpop.f32.mrf.mxu0 }
 0x1f8   :  { %v133_v49 = vadd.f32 %v132_v48, %v113_v47 }
 0x1fa   :  { %v136_v50 = vsel %vm55_vm1, %v133_v49, 0.0 }
 0x1fb   :  { %137 = vadd.xlane.f32.xlu2 %v136_v50  ;;  %v139_v51 = vmul.f32 %v136_v50, %v136_v50 }
 0x1fd   :  { %140 = vadd.xlane.f32.xlu1 %v139_v51 }
 0x1ff   :  { %v134_v52 = vpop.f32.mrf.mxu0 }
 0x213   :  { %170 = vperm.xlu2 %244, %v167_v53  }
 0x21b   :  { %187 = vperm.xlu2 %244, %v184_v54  }
 0x26e   :  { %v138_v55 = vpop.xlane.xlu2 %137 }
 0x26f   :  { %v142_v56 = vmul.f32 0.0625, %v138_v55 }
 0x270   :  { %v141_v57 = vpop.xlane.xlu1 %140 }
 0x271   :  { %v144_v58 = vmul.f32 %v142_v56, %v142_v56  ;;  %v143_v59 = vmul.f32 0.0625, %v141_v57  ;;  %v147_v5 = vsub.f32 %v136_v50, %v142_v56 }
 0x273   :  { %v145_v60 = vsub.f32 %v143_v59, %v144_v58 }
 0x275   :  { %v146_v61 = vmax.f32 %v145_v60, 0.0 }
 0x276   :  { %v171_v11 = vpop.permute.xlu2 %170 }
 0x277   :  { %v148_v62 = vadd.f32 1e-05, %v146_v61 }
 0x279   :  { %248 = vrsqrt.f32 %v148_v62  ;;  %vm155_vm11 = vweird.f32 %v148_v62 }
 0x27e   :  { %v188_v22 = vpop.permute.xlu2 %187 }
 0x27f   :  { %v249_v63 = vpop.eup %248 }
 0x280   :  { %v150_v0 = vmul.f32 %v249_v63, %v148_v62  ;;  %vm156_vm10 = vweird.f32 %v249_v63 }
 0x281   :  { %vm157_vm12 = vmor %vm155_vm11, %vm156_vm10 }
 0x282   :  { %v151_v1 = vmul.f32 %v249_v63, %v150_v0 }
 0x284   :  { %v152_v2 = vmul.f32 0.5, %v151_v1 }
 0x286   :  { %v153_v3 = vsub.f32 1.5, %v152_v2 }
 0x288   :  { %v154_v4 = vmul.f32 %v249_v63, %v153_v3 }
 0x28a   :  { %v158_v8 = vsel %vm157_vm12, %v249_v63, %v154_v4 }
 0x28b   :  { %v159_v9 = vmul.f32 %v158_v8, %v147_v5 }
 0x28d   :  { %v166_v10 = vmul.f32 %v164_v6, %v159_v9 }
 0x28f   :  { %v173_v13 = vadd.f32 %v171_v11, %v166_v10 }
 0x291   :  { %v174_v14 = vmax.f32 %v173_v13, 0.0 }
 0x293   :  { %175 = vrot.lane.b32.xlu0 %v174_v14, %s278_s2  ;;  %178 = vrot.lane.b32.xlu1 %v174_v14, %s276_s15 }
 0x305   :  { %v179_v15 = vpop.permute.xlu1 %178  ;;  %v176_v18 = vpop.permute.xlu0 %175 }
 0x306   :  { %v180_v16 = vsel %vm346_vm0, 0.0, %v179_v15  ;;  %v234_v20 = vpack.c.bf16 %v174_v14, %v176_v18 }
 0x307   :  { %v183_v17 = vpack.c.bf16 %v180_v16, %v180_v16 }
 0x309   :  { %v194_v19 = vsel %vm119_vm5, %v183_v17, 0 }
 0x30a   :  { %202 = vmatpush.bf16.msra.mxu1 %v194_v19 }
 0x30e   :  { %235 = vmatpush.bf16.msk.msra.mxu1 %vm375_vm8, %v234_v20 }
 0x311   :  { %236 = vmatmul.msk.bf16.vlgmr.msra.gmra.mxu1 %vm115_vm9, %v181_v21 }
 0x38e   :  { %v205_v23 = vpop.f32.mrf.mxu1 }
 0x38f   :  { %v206_v7 = vadd.f32 %v205_v23, %v188_v22 }
 0x391   :  { %v209_v24 = vadd.f32 %v206_v7, %v358_v12 }
 0x393   :  { %210 = vst [vmem:[#allocation2] sm:$0xff] %v209_v24 }
 0x394   :  { %221 = dma.vmem_to_hbm [thread:$0]  %s217_s27, 128, %s219_s30, [#allocation3]  }
 0x396   :  { %v207_v25 = vpop.f32.mrf.mxu1 }
 0x397   :  { %274 = dma.done.wait [#allocation3], 128  }
 0x398   :  { %275 = vsyncadd [#allocation3], 4294967168 }
 0x399   :  { %226 = vsyncpa [#allocation3], 1 }

</bundles_post_ra>
